<compile_context>
chip_gen: v5e
topology: v5e:2x2
jax: 0.10.0
libtpu: 0.0.40
codegen_flags: <defaults>
</compile_context>

<pallas_src>
import math
import numpy as np
import jax
import jax.numpy as jnp
from jax import lax
from jax.experimental import pallas as pl
from jax.experimental.pallas import tpu as pltpu

LANE = 128   # lane-pad unit for 2n (128 is valid on all generations; 256 fills v6e/v7x MXU)


# ------------------------- deterministic parameter setup (host-side, NumPy) ----------

def factors(n):
    return [(i, n // i) for i in range(1, math.isqrt(n) + 1) if n % i == 0]


def low_rank_project(M, rank):
    """Rank-`rank` projection via SVD.  Supports batches of matrices."""
    U, S, Vt = np.linalg.svd(M)
    S_sqrt = np.sqrt(S[..., :rank])
    U = U[..., :rank] * S_sqrt[..., None, :]
    Vt = S_sqrt[..., :, None] * Vt[..., :rank, :]
    return U, Vt


def blockdiag_butterfly_project(M, sizes):
    """Rank-1 butterfly projection of a square matrix (NumPy, init-time only)."""
    m, n = M.shape
    assert m == n == sizes[0] * sizes[1]
    # rearrange(M, '(p k) (r s) -> k r p s', k=sizes[1], r=sizes[0])
    Mb = M.reshape(sizes[0], sizes[1], sizes[0], sizes[1]).transpose(1, 2, 0, 3)
    U, Vt = low_rank_project(Mb, rank=1)
    w1_bfly = Vt[:, :, 0, :].transpose(1, 0, 2)   # (s0, s1, s1) == (k, q, p)
    w2_bfly = U[:, :, :, 0].transpose(0, 2, 1)    # (s1, s0, s0) == (l, s, r)
    return w1_bfly, w2_bfly


def _round_up(x, m):
    return (x + m - 1) // m * m


def _vmem_capacity_bytes():
    """Per-core VMEM capacity (generation-aware); conservative 64 MiB fallback (v7x)."""
    try:
        cap = getattr(pltpu.get_tpu_info(), "vmem_capacity_bytes", None)
        if cap:
            return int(cap)
    except Exception:
        pass
    return 64 * 1024 * 1024


# ------------------------- Pallas kernel: single fused butterfly matmul --------------

def _butterfly_matmul_kernel(x_ref, w_ref, o_ref):
    # One batch tile: (tb, 2n_pad)[bf16] @ (2n_pad, 2n_pad)[bf16] -> f32 accumulate.
    # Single MXU matmul per grid step; lane-dense interleaved-complex store.
    o_ref[...] = jnp.dot(x_ref[...], w_ref[...],
                         preferred_element_type=jnp.float32).astype(o_ref.dtype)


def fused_butterfly_matmul(x_ri, w, *, tb, vmem_cap):
    """x_ri: (B_pad, 2n_pad) interleaved-real activations; w: (2n_pad, 2n_pad) folded weight."""
    Bp, nw = x_ri.shape
    assert Bp % tb == 0 and w.shape == (nw, nw)
    grid = (Bp // tb,)

    in_bytes = x_ri.dtype.itemsize
    w_item = w.dtype.itemsize
    flops = 2 * Bp * nw * nw                                      # single dense matmul
    bytes_accessed = in_bytes * Bp * nw + 4 * Bp * nw + w_item * nw * nw

    def build(single_buffer_weight):
        # VMEM estimate: resident weight (1 or 2 buffers) + double-buffered in/out tiles.
        w_bufs = 1 if single_buffer_weight else 2
        vmem_est = (w_bufs * w_item * nw * nw
                    + 2 * in_bytes * tb * nw          # input tiles (double-buffered)
                    + 2 * 4 * tb * nw)                # f32 output tiles (double-buffered)
        # Always set the limit explicitly (v5e scoped default is only 16 MiB); clamp to
        # 90% of this generation's per-core capacity (64 MiB v7x, 128 MiB v5e/v6e).
        vmem_limit = int(min(max(vmem_est + (4 << 20), 32 << 20), int(0.9 * vmem_cap)))

        if single_buffer_weight:
            # Constant index_map -> weight is DMA'd once and stays resident; Buffered(1)
            # halves its VMEM footprint vs the default double-buffering.
            w_spec = pl.BlockSpec((nw, nw), lambda i: (0, 0), pipeline_mode=pl.Buffered(1))
        else:
            w_spec = pl.BlockSpec((nw, nw), lambda i: (0, 0))

        return pl.pallas_call(
            _butterfly_matmul_kernel,
            out_shape=jax.ShapeDtypeStruct((Bp, nw), jnp.float32),
            grid_spec=pltpu.PrefetchScalarGridSpec(
                num_scalar_prefetch=0,
                grid=grid,
                in_specs=[pl.BlockSpec((tb, nw), lambda i: (i, 0)),   # batch tile
                          w_spec],                                     # resident weight
                out_specs=pl.BlockSpec((tb, nw), lambda i: (i, 0)),    # lane-dense store
            ),
            compiler_params=pltpu.CompilerParams(
                dimension_semantics=("parallel",),       # batch tiles split across TCs
                vmem_limit_bytes=vmem_limit),
            cost_estimate=pl.CostEstimate(flops=flops, transcendentals=0,
                                          bytes_accessed=bytes_accessed),
        )

    try:
        return build(True)(x_ri, w)
    except Exception:
        # Fallback for jax builds that reject pipeline_mode=pl.Buffered(1); only costs one
        # extra resident weight copy in VMEM (functionally identical).
        return build(False)(x_ri, w)


# ------------------------- ButterflyFFT module ---------------------------------------

class ButterflyFFT:
    def __init__(self, n, direction="fft", norm="ortho", weight_dtype=jnp.bfloat16):
        assert direction in ("fft", "ifft")
        sz = factors(n)[-1]
        sizes = (sz[1], sz[0])                    # (s0, s1), s0 >= s1
        eye = np.eye(n, dtype=np.complex128)
        transform = np.fft.fft if direction == "fft" else np.fft.ifft
        dft = transform(eye, norm=norm, axis=-1).T
        # perm = rearrange(arange(n), '(i j) -> (j i)', j=sizes[0])
        perm = np.arange(n).reshape(sizes[1], sizes[0]).T.reshape(-1)
        w1, w2 = blockdiag_butterfly_project(dft[:, perm], sizes=sizes)

        self.n = n
        self.sizes = sizes
        self.perm = perm                          # kept for the reference check
        self.w1_c = w1.astype(np.complex64)       # (k, q, p) = (s0, s1, s1)
        self.w2_c = w2.astype(np.complex64)       # (l, s, r) = (s1, s0, s0)

        # ---- Fold ALL linear glue (input perm, stage-1, mid (k,q)->(l,r) transpose,
        #      stage-2, output perm) into ONE complex (n, n) matrix:  y = x @ W_c. ----
        s0, s1 = sizes
        k, q, p = w1.shape
        l, s, r = w2.shape
        A = np.zeros((n, n), dtype=np.complex128)
        ki, qi, pi = np.meshgrid(np.arange(k), np.arange(q), np.arange(p), indexing="ij")
        A[(pi * s0 + ki).ravel(), (ki * q + qi).ravel()] = w1.ravel()
        Bm = np.zeros((n, n), dtype=np.complex128)
        li, si, ri = np.meshgrid(np.arange(l), np.arange(s), np.arange(r), indexing="ij")
        Bm[(ri * l + li).ravel(), (si * l + li).ravel()] = w2.ravel()
        W_c = A @ Bm                               # exact fold of both butterfly stages

        # ---- Interleaved stacked-real form, lane-padded.  Rows 2i / 2i+1 are fed by
        #      Re(x_i) / Im(x_i) (== complex64 memory order); cols 2j / 2j+1 produce
        #      Re(y_j) / Im(y_j).  Rows/cols >= 2n are zero padding to a lane multiple. ----
        two_n_pad = max(LANE, _round_up(2 * n, LANE))
        Wri = np.zeros((two_n_pad, two_n_pad), dtype=np.float32)
        Wr, Wi = W_c.real, W_c.imag
        Wri[0:2 * n:2, 0:2 * n:2] = Wr
        Wri[0:2 * n:2, 1:2 * n:2] = Wi
        Wri[1:2 * n:2, 0:2 * n:2] = -Wi
        Wri[1:2 * n:2, 1:2 * n:2] = Wr
        self.two_n_pad = two_n_pad
        self.W = jnp.asarray(Wri).astype(weight_dtype)   # bf16 weight, f32 MXU accumulate
        self.vmem_cap = _vmem_capacity_bytes()

        # TODO(synk): for n >= ~1024 the folded dense (2n,2n) weight wastes the butterfly's
        # sqrt(n) FLOP advantage and stops fitting per-core VMEM; switch to the
        # block-structured two-stage path (batched block matmuls, g blocks grouped so
        # K,N >= 256) for large n.

    def _plan_batch(self, B, tb):
        nw = self.two_n_pad
        if tb is None:
            # 12 bytes per activation element: 2x bf16 input + 2x f32 output tiles
            # (double-buffered).  Keep weight + tiles under ~60% of per-core VMEM.
            w_resident = int(self.W.dtype.itemsize) * nw * nw
            budget = int(0.6 * self.vmem_cap) - w_resident
            tb = budget // (12 * nw)
        tb = min(max(int(tb), 16), 2048, _round_up(B, 16))
        tb = _round_up(tb, 16)                    # bf16 sublane packing (16, 128)
        return tb, _round_up(B, tb)

    def __call__(self, x, *, tb=None):
        n, nw = self.n, self.two_n_pad
        shp = x.shape
        B = int(np.prod(shp[:-1]))
        xf = jnp.reshape(x, (B, n))

        # Interleaved [Re0, Im0, Re1, Im1, ...] bf16 activation plane (complex64 memory
        # order); the de/re-interleave itself is folded into W's row/column order above.
        x_ri = jnp.stack([jnp.real(xf), jnp.imag(xf)], axis=-1).reshape(B, 2 * n)
        x_ri = x_ri.astype(self.W.dtype)

        tb_eff, B_pad = self._plan_batch(B, tb)
        x_ri = jnp.pad(x_ri, ((0, B_pad - B), (0, nw - 2 * n)))

        out_ri = fused_butterfly_matmul(x_ri, self.W, tb=tb_eff, vmem_cap=self.vmem_cap)
        out_ri = out_ri[:B, :2 * n].reshape(B, n, 2)
        out = lax.complex(out_ri[..., 0], out_ri[..., 1])        # complex64
        return out.reshape(shp)


# ------------------------- pure-NumPy reference (exact butterfly semantics) ----------

def reference_forward(x_np, perm, w1, w2):
    shp = x_np.shape
    n = shp[-1]
    w1 = w1.astype(np.complex128)
    w2 = w2.astype(np.complex128)
    y = x_np.astype(np.complex128)[..., perm].reshape(-1, n)
    k, q, p = w1.shape
    l, s, r = w2.shape
    out1 = np.einsum("bkp,kqp->bkq", y.reshape(-1, k, p), w1)
    out1 = np.swapaxes(out1.reshape(-1, r, l), -1, -2)       # (b, l, r)
    out2 = np.einsum("blr,lsr->bls", out1, w2)
    out2 = np.swapaxes(out2, -1, -2).reshape(-1, s * l)
    return out2.reshape(shp)


if __name__ == "__main__":
    n = 16
    mod = ButterflyFFT(n, direction="fft", norm="ortho")

    key = jax.random.PRNGKey(0)
    k1, k2 = jax.random.split(key)
    xr = jax.random.normal(k1, (2, 8, n), dtype=jnp.float32)
    xi = jax.random.normal(k2, (2, 8, n), dtype=jnp.float32)
    x = (xr + 1j * xi).astype(jnp.complex64)

    out = jax.block_until_ready(mod(x))

    ref = reference_forward(np.asarray(x).astype(np.complex128),
                            mod.perm, mod.w1_c, mod.w2_c)
    assert out.shape == x.shape and out.dtype == jnp.complex64
    np.testing.assert_allclose(np.asarray(out), ref.astype(np.complex64),
                               atol=2e-2, rtol=2e-2)
    print("KERNEL_OK")
</pallas_src>

<mosaic_0001>
module attributes {stable_mosaic.version = 11 : i64} {
  func.func @_butterfly_matmul_kernel(%arg0: i32, %arg1: memref<16x128xbf16, #tpu.memory_space<vmem>>, %arg2: memref<128x128xbf16, #tpu.memory_space<vmem>>, %arg3: memref<16x128xf32, #tpu.memory_space<vmem>>) attributes {dimension_semantics = [#tpu.dimension_semantics<parallel>], iteration_bounds = array<i64: 1>, scalar_prefetch = 0 : i64, scratch_operands = 0 : i64, tpu.core_type = #tpu.core_type<tc>, window_params = [{transform_indices = @transform_0, window_bounds = array<i64: 16, 128>}, {pipeline_mode = #tpu.pipeline_mode<synchronous>, transform_indices = @transform_1, window_bounds = array<i64: 128, 128>}, {transform_indices = @transform_2, window_bounds = array<i64: 16, 128>}]} {
    %c0 = arith.constant 0 : index
    %c0_0 = arith.constant 0 : index
    %0 = vector.load %arg1[%c0, %c0_0] : memref<16x128xbf16, #tpu.memory_space<vmem>>, vector<16x128xbf16>
    %c0_1 = arith.constant 0 : index
    %c0_2 = arith.constant 0 : index
    %1 = vector.load %arg2[%c0_1, %c0_2] : memref<128x128xbf16, #tpu.memory_space<vmem>>, vector<128x128xbf16>
    %cst = arith.constant dense<0.000000e+00> : vector<16x128xf32>
    %2 = tpu.matmul %0, %1, %cst {dimension_numbers = #tpu.dot_dimension_numbers<[1], [0], [0], [1], [0, 0, 1, 1], [], []>} : vector<16x128xbf16>, vector<128x128xbf16>, vector<16x128xf32> -> vector<16x128xf32>
    %c0_3 = arith.constant 0 : index
    %c0_4 = arith.constant 0 : index
    %3 = vector.load %arg3[%c0_3, %c0_4] : memref<16x128xf32, #tpu.memory_space<vmem>>, vector<16x128xf32>
    tpu.vector_store %arg3[%c0_3, %c0_4], %2 {strides = array<i32>} : memref<16x128xf32, #tpu.memory_space<vmem>>, vector<16x128xf32>,
    return
  }
  func.func @transform_0(%arg0: i32) -> (i32, i32) {
    %c0_i32 = arith.constant 0 : i32
    %c0_i32_0 = arith.constant 0 : i32
    return %arg0, %c0_i32 : i32, i32
  }
  func.func @transform_1(%arg0: i32) -> (i32, i32) {
    %c0_i32 = arith.constant 0 : i32
    %c0_i32_0 = arith.constant 0 : i32
    %c0_i32_1 = arith.constant 0 : i32
    return %c0_i32, %c0_i32_0 : i32, i32
  }
  func.func @transform_2(%arg0: i32) -> (i32, i32) {
    %c0_i32 = arith.constant 0 : i32
    %c0_i32_0 = arith.constant 0 : i32
    return %arg0, %c0_i32 : i32, i32
  }
}

module attributes {stable_mosaic.version = 11 : i64} {
  func.func @_butterfly_matmul_kernel(%arg0: i32, %arg1: memref<16x128xbf16, #tpu.memory_space<vmem>>, %arg2: memref<128x128xbf16, #tpu.memory_space<vmem>>, %arg3: memref<16x128xf32, #tpu.memory_space<vmem>>) attributes {dimension_semantics = [#tpu.dimension_semantics<parallel>], iteration_bounds = array<i64: 1>, scalar_prefetch = 0 : i64, scratch_operands = 0 : i64, tpu.core_type = #tpu.core_type<tc>, window_params = [{transform_indices = @transform_0, window_bounds = array<i64: 16, 128>}, {pipeline_mode = #tpu.pipeline_mode<synchronous>, transform_indices = @transform_1, window_bounds = array<i64: 128, 128>}, {transform_indices = @transform_2, window_bounds = array<i64: 16, 128>}]} {
    %c0 = arith.constant 0 : index
    %c0_0 = arith.constant 0 : index
    %0 = vector.load %arg1[%c0, %c0_0] : memref<16x128xbf16, #tpu.memory_space<vmem>>, vector<16x128xbf16>
    %c0_1 = arith.constant 0 : index
    %c0_2 = arith.constant 0 : index
    %1 = vector.load %arg2[%c0_1, %c0_2] : memref<128x128xbf16, #tpu.memory_space<vmem>>, vector<128x128xbf16>
    %cst = arith.constant dense<0.000000e+00> : vector<16x128xf32>
    %2 = tpu.matmul %0, %1, %cst {dimension_numbers = #tpu.dot_dimension_numbers<[1], [0], [0], [1], [0, 0, 1, 1], [], []>} : vector<16x128xbf16>, vector<128x128xbf16>, vector<16x128xf32> -> vector<16x128xf32>
    %c0_3 = arith.constant 0 : index
    %c0_4 = arith.constant 0 : index
    %3 = vector.load %arg3[%c0_3, %c0_4] : memref<16x128xf32, #tpu.memory_space<vmem>>, vector<16x128xf32>
    tpu.vector_store %arg3[%c0_3, %c0_4], %2 {strides = array<i32>} : memref<16x128xf32, #tpu.memory_space<vmem>>, vector<16x128xf32>,
    return
  }
  func.func @transform_0(%arg0: i32) -> (i32, i32) {
    %c0_i32 = arith.constant 0 : i32
    %c0_i32_0 = arith.constant 0 : i32
    return %arg0, %c0_i32 : i32, i32
  }
  func.func @transform_1(%arg0: i32) -> (i32, i32) {
    %c0_i32 = arith.constant 0 : i32
    %c0_i32_0 = arith.constant 0 : i32
    %c0_i32_1 = arith.constant 0 : i32
    return %c0_i32, %c0_i32_0 : i32, i32
  }
  func.func @transform_2(%arg0: i32) -> (i32, i32) {
    %c0_i32 = arith.constant 0 : i32
    %c0_i32_0 = arith.constant 0 : i32
    return %arg0, %c0_i32 : i32, i32
  }
}

</mosaic_0001>

<bundles_post_ra>
// kernel: tpu_custom_call.1
= control target key start
LH: loop header
LB: loop body
LE: loop exit
PB: predicated region body
PF: predicated region fallthrough
CT: control target
= control target key end

     0   :  { %7 = vsyncpa [#allocation3], 0  ;;  %s313_s0 = inlined_call_operand.hbm [shape: bf16[16,128], index: 0, kind: input, shape index: {}]   ;;  %s314_s1 = inlined_call_operand.hbm [shape: bf16[128,128], index: 1, kind: input, shape index: {}]   ;;  %s315_s2 = inlined_call_operand.hbm [shape: f32[16,128], index: 2, kind: output, shape index: {}]  }
   0x1   :  { %8 = vsyncpa [#allocation6], 0 }
   0x2   :  { %9 = vsyncpa [#allocation4], 0  ;;  %s14_s11 = sshll.u32 %s313_s0, 4  ;;  %s282_s12 = smov [#allocation2]   ;;  %s15_s11 = int_to_ptr.hbm [resolvable:$true] %s14_s11 }
   0x3   :  { %s16_s13 = sshll.u32 %s282_s12, 4  ;;  %s27_s16 = sshll.u32 %s314_s1, 4  ;;  %s17_s13 = int_to_ptr.vmem [resolvable:$true] %s16_s13  ;;  %s28_s16 = int_to_ptr.hbm [resolvable:$true] %s27_s16 }
   0x4   :  { %s283_s17 = smov 64   ;;  %s284_s18 = smov 4  }
   0x5   :  { %22 = dma.hbm_to_vmem [thread:$0]  %s15_s11, 128, %s17_s13, [#allocation3], %s283_s17, %s283_s17, %s284_s18  }
   0x6   :  { %s285_s19 = smov [#allocation5]  }
   0x7   :  { %s29_s20 = sshll.u32 %s285_s19, 4  ;;  %s30_s20 = int_to_ptr.vmem [resolvable:$true] %s29_s20 }
   0x8   :  { %35 = dma.hbm_to_vmem [thread:$0]  %s28_s16, 1024, %s30_s20, [#allocation6], %s283_s17, %s283_s17, %s284_s18  }
   0x9   :  { %276 = dma.done.wait [#allocation3], 128  }
   0xa   :  { %277 = vsyncadd [#allocation3], 4294967168 }
   0xb   :  { %278 = dma.done.wait [#allocation6], 1024  }
   0xc   :  { %279 = vsyncadd [#allocation6], 4294966272  ;;  %v196_v0 = vld [vmem:[#allocation5 + $0x38] sm:$0xff]  ;;  %v195_v1 = vld [vmem:[#allocation5 + $0x30] sm:$0xff]  ;;  %s286_s0 = smov [#allocation7]   ;;  %s138_s23 = sshll.u32 %s315_s2, 4  ;;  %s139_s23 = int_to_ptr.hbm [resolvable:$true] %s138_s23 }
   0xd   :  { %116 = vmatpush.bf16.msra.mxu0 %v196_v0  ;;  %v194_v2 = vld [vmem:[#allocation5 + $0x28] sm:$0xff]  ;;  %v193_v3 = vld [vmem:[#allocation5 + $0x20] sm:$0xff]  ;;  %v192_v4 = vld [vmem:[#allocation5 + $0x18] sm:$0xff]  ;;  %s136_s1 = sshll.u32 %s286_s0, 4  ;;  %s287_s24 = smov 128   ;;  %s137_s1 = int_to_ptr.vmem [resolvable:$true] %s136_s1 }
   0xe   :  { %v191_v5 = vld [vmem:[#allocation5 + $0x10] sm:$0xff]  ;;  %v190_v6 = vld [vmem:[#allocation5 + $0x8] sm:$0xff]  ;;  %v189_v7 = vld [vmem:[#allocation5] sm:$0xff]  ;;  %s288_s25 = smov 8  }
   0xf   :  { %v188_v8 = vld [vmem:[#allocation2] sm:$0xff] }
  0x11   :  { %117 = vmatpush.bf16.msra.mxu0 %v195_v1 }
  0x15   :  { %118 = vmatpush.bf16.msra.mxu0 %v194_v2 }
  0x19   :  { %119 = vmatpush.bf16.msra.mxu0 %v193_v3 }
  0x1d   :  { %120 = vmatpush.bf16.msra.mxu0 %v192_v4 }
  0x21   :  { %121 = vmatpush.bf16.msra.mxu0 %v191_v5 }
  0x25   :  { %122 = vmatpush.bf16.msra.mxu0 %v190_v6 }
  0x29   :  { %123 = vmatpush.bf16.msra.mxu0 %v189_v7 }
  0x2c   :  { %124 = vmatmul.bf16.vlgmr.msra.gmra.mxu0 %v188_v8 }
  0xa9   :  { %v125_v9 = vpop.f32.mrf.mxu0 }
  0xaa   :  { %130 = vst [vmem:[#allocation7] sm:$0xff] %v125_v9 }
  0xb1   :  { %v127_v10 = vpop.f32.mrf.mxu0 }
  0xb2   :  { %131 = vst [vmem:[#allocation7 + $0x8] sm:$0xff] %v127_v10 }
  0xb3   :  { %144 = dma.vmem_to_hbm [thread:$0]  %s137_s1, 256, %s139_s23, [#allocation4], %s287_s24, %s287_s24, %s288_s25  }
  0xb4   :  { %280 = dma.done.wait [#allocation4], 256  }
  0xb5   :  { %281 = vsyncadd [#allocation4], 4294967040 }
  0xb6   :  { %149 = vsyncpa [#allocation3], 1 }
  0xb7   :  { %150 = vsyncpa [#allocation6], 1 }
  0xb8   :  { %151 = vsyncpa [#allocation4], 1 }

// kernel: tpu_custom_call.1
= control target key start
LH: loop header
LB: loop body
LE: loop exit
PB: predicated region body
PF: predicated region fallthrough
CT: control target
= control target key end

     0   :  { %7 = vsyncpa [#allocation3], 0  ;;  %s313_s0 = inlined_call_operand.hbm [shape: bf16[16,128], index: 0, kind: input, shape index: {}]   ;;  %s314_s1 = inlined_call_operand.hbm [shape: bf16[128,128], index: 1, kind: input, shape index: {}]   ;;  %s315_s2 = inlined_call_operand.hbm [shape: f32[16,128], index: 2, kind: output, shape index: {}]  }
   0x1   :  { %8 = vsyncpa [#allocation6], 0 }
   0x2   :  { %9 = vsyncpa [#allocation4], 0  ;;  %s14_s11 = sshll.u32 %s313_s0, 4  ;;  %s282_s12 = smov [#allocation2]   ;;  %s15_s11 = int_to_ptr.hbm [resolvable:$true] %s14_s11 }
   0x3   :  { %s16_s13 = sshll.u32 %s282_s12, 4  ;;  %s27_s16 = sshll.u32 %s314_s1, 4  ;;  %s17_s13 = int_to_ptr.vmem [resolvable:$true] %s16_s13  ;;  %s28_s16 = int_to_ptr.hbm [resolvable:$true] %s27_s16 }
   0x4   :  { %s283_s17 = smov 64   ;;  %s284_s18 = smov 4  }
   0x5   :  { %22 = dma.hbm_to_vmem [thread:$0]  %s15_s11, 128, %s17_s13, [#allocation3], %s283_s17, %s283_s17, %s284_s18  }
   0x6   :  { %s285_s19 = smov [#allocation5]  }
   0x7   :  { %s29_s20 = sshll.u32 %s285_s19, 4  ;;  %s30_s20 = int_to_ptr.vmem [resolvable:$true] %s29_s20 }
   0x8   :  { %35 = dma.hbm_to_vmem [thread:$0]  %s28_s16, 1024, %s30_s20, [#allocation6], %s283_s17, %s283_s17, %s284_s18  }
   0x9   :  { %276 = dma.done.wait [#allocation3], 128  }
   0xa   :  { %277 = vsyncadd [#allocation3], 4294967168 }
   0xb   :  { %278 = dma.done.wait [#allocation6], 1024  }
   0xc   :  { %279 = vsyncadd [#allocation6], 4294966272  ;;  %v196_v0 = vld [vmem:[#allocation5 + $0x38] sm:$0xff]  ;;  %v195_v1 = vld [vmem:[#allocation5 + $0x30] sm:$0xff]  ;;  %s286_s0 = smov [#allocation7]   ;;  %s138_s23 = sshll.u32 %s315_s2, 4  ;;  %s139_s23 = int_to_ptr.hbm [resolvable:$true] %s138_s23 }
   0xd   :  { %116 = vmatpush.bf16.msra.mxu0 %v196_v0  ;;  %v194_v2 = vld [vmem:[#allocation5 + $0x28] sm:$0xff]  ;;  %v193_v3 = vld [vmem:[#allocation5 + $0x20] sm:$0xff]  ;;  %v192_v4 = vld [vmem:[#allocation5 + $0x18] sm:$0xff]  ;;  %s136_s1 = sshll.u32 %s286_s0, 4  ;;  %s287_s24 = smov 128   ;;  %s137_s1 = int_to_ptr.vmem [resolvable:$true] %s136_s1 }
   0xe   :  { %v191_v5 = vld [vmem:[#allocation5 + $0x10] sm:$0xff]  ;;  %v190_v6 = vld [vmem:[#allocation5 + $0x8] sm:$0xff]  ;;  %v189_v7 = vld [vmem:[#allocation5] sm:$0xff]  ;;  %s288_s25 = smov 8  }
   0xf   :  { %v188_v8 = vld [vmem:[#allocation2] sm:$0xff] }
  0x11   :  { %117 = vmatpush.bf16.msra.mxu0 %v195_v1 }
  0x15   :  { %118 = vmatpush.bf16.msra.mxu0 %v194_v2 }
  0x19   :  { %119 = vmatpush.bf16.msra.mxu0 %v193_v3 }
  0x1d   :  { %120 = vmatpush.bf16.msra.mxu0 %v192_v4 }
  0x21   :  { %121 = vmatpush.bf16.msra.mxu0 %v191_v5 }
  0x25   :  { %122 = vmatpush.bf16.msra.mxu0 %v190_v6 }
  0x29   :  { %123 = vmatpush.bf16.msra.mxu0 %v189_v7 }
  0x2c   :  { %124 = vmatmul.bf16.vlgmr.msra.gmra.mxu0 %v188_v8 }
  0xa9   :  { %v125_v9 = vpop.f32.mrf.mxu0 }
  0xaa   :  { %130 = vst [vmem:[#allocation7] sm:$0xff] %v125_v9 }
  0xb1   :  { %v127_v10 = vpop.f32.mrf.mxu0 }
  0xb2   :  { %131 = vst [vmem:[#allocation7 + $0x8] sm:$0xff] %v127_v10 }
  0xb3   :  { %144 = dma.vmem_to_hbm [thread:$0]  %s137_s1, 256, %s139_s23, [#allocation4], %s287_s24, %s287_s24, %s288_s25  }
  0xb4   :  { %280 = dma.done.wait [#allocation4], 256  }
  0xb5   :  { %281 = vsyncadd [#allocation4], 4294967040 }
  0xb6   :  { %149 = vsyncpa [#allocation3], 1 }
  0xb7   :  { %150 = vsyncpa [#allocation6], 1 }
  0xb8   :  { %151 = vsyncpa [#allocation4], 1 }

</bundles_post_ra>
